<compile_context>
chip_gen: v6e
topology: v6e:2x2x1
jax: 0.10.0
libtpu: 0.0.40
codegen_flags: <defaults>
</compile_context>

<pallas_src>
import jax
import jax.numpy as jnp
import numpy as np
from jax import lax
from jax.experimental import pallas as pl
from jax.experimental.pallas import tpu as pltpu


def _make_kernel(H, W, TN, C, mx_dtype):
    inv_w = 1.0 / float(W)
    h_max = float(H - 1)
    w_max = float(W - 1)

    def warp_kernel(src_ref, flow_ref, out_ref):
        # src_ref : (1, C*H, W)  resident across the whole tile axis (per batch index)
        # flow_ref: (1, 2, TN)   flow slice for this output-pixel tile
        # out_ref : (1, C, TN)
        fl = flow_ref[0].astype(jnp.float32)                 # (2, TN)
        flow_y = fl[0:1, :]                                   # (1, TN) row displacement
        flow_x = fl[1:2, :]                                   # (1, TN) col displacement

        # Flattened output-pixel indices covered by this tile: p = j*TN + [0, TN).
        j = pl.program_id(1)
        p = lax.broadcasted_iota(jnp.int32, (1, TN), 1) + j * TN
        pf = p.astype(jnp.float32)
        # Exact row/col: the +0.5 midpoint keeps floor() exact for padded H*W < 2**22.
        rowf = jnp.floor((pf + 0.5) * inv_w)
        colf = pf - rowf * float(W)

        # Sample coordinates; align_corners=True cancels the module's grid
        # normalization exactly, padding_mode='border' == clamp.
        iy = jnp.clip(rowf + flow_y, 0.0, h_max)              # (1, TN)
        ix = jnp.clip(colf + flow_x, 0.0, w_max)              # (1, TN)

        # Separable bilinear tents: only (H, TN) + (W, TN) slabs, never (HW, TN).
        r_idx = lax.broadcasted_iota(jnp.int32, (H, 1), 0).astype(jnp.float32)
        c_idx = lax.broadcasted_iota(jnp.int32, (W, 1), 0).astype(jnp.float32)
        wy = jnp.maximum(0.0, 1.0 - jnp.abs(r_idx - iy))      # (H, TN)
        wx = jnp.maximum(0.0, 1.0 - jnp.abs(c_idx - ix))      # (W, TN)

        # Stage 1 (MXU): contract the source-column axis.
        src = src_ref[0].astype(mx_dtype)                     # (C*H, W) (no-op cast for f32)
        t = jnp.dot(src, wx.astype(mx_dtype),
                    preferred_element_type=jnp.float32)       # (C*H, TN)

        # Stage 2 (VPU + sublane reduce): weight by the row tent, sum rows per channel.
        rows = []
        for c in range(C):                                    # C is small (1-4)
            tc = t[c * H:(c + 1) * H, :]                      # (H, TN) static slice
            rows.append(jnp.sum(tc * wy, axis=0, keepdims=True))  # (1, TN)
        out = jnp.concatenate(rows, axis=0)                   # (C, TN), single dense store
        out_ref[0] = out.astype(out_ref.dtype)

    return warp_kernel


def _tile_candidates(HWp):
    """Multiples of 128 that divide the (padded) pixel axis, descending, capped at 1024."""
    n128 = HWp // 128
    cands = [128 * k for k in range(n128, 0, -1) if n128 % k == 0]
    small = [t for t in cands if t <= 1024]
    return small if small else [cands[-1]]


def _vmem_estimate_bytes(C, H, W, TN):
    f32 = 4
    return (2 * C * H * W * f32       # resident src block (default double-buffered)
            + 2 * 2 * TN * f32        # flow tiles (double-buffered)
            + 2 * C * TN * f32        # out tiles (double-buffered)
            + (H + W) * TN * f32      # wy + wx tent slabs
            + 2 * C * H * TN * f32)   # t and one same-size temp


def _pick_tile(HWp, B, C, H, W, vmem_cap):
    budget = max(8 << 20, vmem_cap // 3)
    cands = _tile_candidates(HWp)
    tn = cands[-1]                    # 128 fallback always divides HWp
    for cand in cands:
        if B == 1 and HWp >= 256 and HWp // cand < 2:
            continue                  # keep both v7x TensorCores busy for B == 1
        if _vmem_estimate_bytes(C, H, W, cand) <= budget:
            tn = cand
            break
    return tn


def transformer_2d_reg(src, flow, *, use_bf16_weights=False):
    """Pallas equivalent of Transformer_2DReg.forward(src, flow)."""
    B, C, H, W = src.shape
    assert flow.shape == (B, 2, H, W)
    HW = H * W
    # Pad the flattened output-pixel axis up to a lane-dense multiple of 128.
    HWp = ((HW + 127) // 128) * 128
    assert HWp < (1 << 22), "midpoint floor trick requires (padded) H*W < 2**22"

    try:
        info = pltpu.get_tpu_info()
        vmem_cap = int(getattr(info, "vmem_capacity_bytes", 128 << 20))
    except Exception:                 # not on TPU / emulation
        vmem_cap = 128 << 20

    TN = _pick_tile(HWp, B, C, H, W, vmem_cap)
    n_tiles = HWp // TN

    mx_dtype = (jnp.bfloat16 if (use_bf16_weights and src.dtype == jnp.bfloat16)
                else jnp.float32)

    src_rows = src.reshape(B, C * H, W)           # stage-1 LHS (no transpose needed)
    flow_flat = flow.reshape(B, 2, HW)
    if HWp != HW:
        flow_flat = jnp.pad(flow_flat, ((0, 0), (0, 0), (0, HWp - HW)))

    est = _vmem_estimate_bytes(C, H, W, TN)
    # Generation-aware limit: ~3/4 of physical VMEM (96 MiB on 128-MiB parts,
    # 48 MiB on v7x), never below 16 MiB.
    vmem_limit = int(min(max(2 * est, 16 << 20), (3 * vmem_cap) // 4))

    cost = pl.CostEstimate(
        flops=(2 * B * C * HW * HWp          # stage-1 matmul over all tiles
               + 2 * B * C * H * HWp         # stage-2 weight + row reduce
               + 8 * B * (H + W) * HWp),     # tent slab build
        transcendentals=0,
        bytes_accessed=(src.size * src.dtype.itemsize
                        + B * 2 * HWp * flow.dtype.itemsize
                        + B * C * HWp * src.dtype.itemsize),
    )

    out_flat = pl.pallas_call(
        _make_kernel(H, W, TN, C, mx_dtype),
        out_shape=jax.ShapeDtypeStruct((B, C, HWp), src.dtype),
        grid_spec=pltpu.PrefetchScalarGridSpec(
            num_scalar_prefetch=0,
            grid=(B, n_tiles),
            in_specs=[
                # src rows: full (C*H, W) block, index ignores the tile axis -> resident.
                pl.BlockSpec((1, C * H, W), lambda b, j: (b, 0, 0)),
                # flow: only the (2, TN) slice feeding this output tile (tiny DMA).
                pl.BlockSpec((1, 2, TN), lambda b, j: (b, 0, j)),
            ],
            out_specs=pl.BlockSpec((1, C, TN), lambda b, j: (b, 0, j)),
        ),
        compiler_params=pltpu.CompilerParams(
            dimension_semantics=("parallel", "parallel"),
            vmem_limit_bytes=vmem_limit),
        cost_estimate=cost,
    )(src_rows, flow_flat)

    return out_flat[:, :, :HW].reshape(B, C, H, W)


def _ref_warp(src, flow):
    """Pure-JAX reference (same math as torch grid_sample, border, align_corners=True)."""
    B, C, H, W = src.shape
    row = jnp.arange(H, dtype=jnp.float32)[:, None]
    col = jnp.arange(W, dtype=jnp.float32)[None, :]
    iy = jnp.clip(row + flow[:, 0], 0.0, H - 1.0)   # (B, H, W)
    ix = jnp.clip(col + flow[:, 1], 0.0, W - 1.0)
    y0f = jnp.floor(iy)
    x0f = jnp.floor(ix)
    wy = iy - y0f
    wx = ix - x0f
    y0 = y0f.astype(jnp.int32)
    x0 = x0f.astype(jnp.int32)
    y1 = jnp.minimum(y0 + 1, H - 1)
    x1 = jnp.minimum(x0 + 1, W - 1)
    sf = src.reshape(B, C, H * W)

    def g(yi, xi):
        idx = (yi * W + xi).reshape(B, 1, H * W)
        idx = jnp.broadcast_to(idx, (B, C, H * W))
        return jnp.take_along_axis(sf, idx, axis=2).reshape(B, C, H, W)

    out = (((1 - wy) * (1 - wx))[:, None] * g(y0, x0)
           + ((1 - wy) * wx)[:, None] * g(y0, x1)
           + (wy * (1 - wx))[:, None] * g(y1, x0)
           + (wy * wx)[:, None] * g(y1, x1))
    return out


if __name__ == "__main__":
    key = jax.random.PRNGKey(0)
    k1, k2 = jax.random.split(key)
    B, C, H, W = 2, 4, 16, 16
    src = jax.random.normal(k1, (B, C, H, W), dtype=jnp.float32)
    # flows of a few pixels, some deliberately pointing out of bounds to hit border mode
    flow = jax.random.normal(k2, (B, 2, H, W), dtype=jnp.float32) * 3.0

    out = transformer_2d_reg(src, flow)
    out = jax.block_until_ready(out)

    ref = _ref_warp(src, flow)
    assert out.shape == (B, C, H, W)
    np.testing.assert_allclose(np.asarray(out), np.asarray(ref), rtol=1e-5, atol=1e-5)
    print("KERNEL_OK")
</pallas_src>

<mosaic_0001>
module attributes {stable_mosaic.version = 11 : i64} {
  func.func @warp_kernel(%arg0: i32, %arg1: i32, %arg2: memref<1x64x16xf32, #tpu.memory_space<vmem>>, %arg3: memref<1x2x256xf32, #tpu.memory_space<vmem>>, %arg4: memref<1x4x256xf32, #tpu.memory_space<vmem>>) attributes {dimension_semantics = [#tpu.dimension_semantics<parallel>, #tpu.dimension_semantics<parallel>], iteration_bounds = array<i64: 2, 1>, scalar_prefetch = 0 : i64, scratch_operands = 0 : i64, tpu.core_type = #tpu.core_type<tc>, window_params = [{transform_indices = @transform_0, window_bounds = array<i64: 1, 64, 16>}, {transform_indices = @transform_1, window_bounds = array<i64: 1, 2, 256>}, {transform_indices = @transform_2, window_bounds = array<i64: 1, 4, 256>}]} {
    %c0 = arith.constant 0 : index
    %c0_0 = arith.constant 0 : index
    %c0_1 = arith.constant 0 : index
    %0 = vector.load %arg3[%c0, %c0_0, %c0_1] : memref<1x2x256xf32, #tpu.memory_space<vmem>>, vector<1x2x256xf32>
    %1 = vector.shape_cast %0 : vector<1x2x256xf32> to vector<2x256xf32>
    %2 = vector.extract_strided_slice %1 {offsets = [0, 0], sizes = [1, 256], strides = [1, 1]} : vector<2x256xf32> to vector<1x256xf32>
    %3 = vector.extract_strided_slice %1 {offsets = [1, 0], sizes = [1, 256], strides = [1, 1]} : vector<2x256xf32> to vector<1x256xf32>
    %4 = tpu.iota {dimensions = array<i32: 1>} : vector<1x256xi32>
    %c256_i32 = arith.constant 256 : i32
    %5 = arith.muli %arg1, %c256_i32 : i32
    %6 = vector.broadcast %5 : i32 to vector<1x256xi32>
    %7 = arith.addi %4, %6 : vector<1x256xi32>
    %8 = arith.sitofp %7 : vector<1x256xi32> to vector<1x256xf32>
    %cst = arith.constant 5.000000e-01 : f32
    %9 = vector.broadcast %cst : f32 to vector<1x256xf32>
    %10 = arith.addf %8, %9 : vector<1x256xf32>
    %cst_2 = arith.constant 6.250000e-02 : f32
    %11 = vector.broadcast %cst_2 : f32 to vector<1x256xf32>
    %12 = arith.mulf %10, %11 : vector<1x256xf32>
    %13 = math.floor %12 : vector<1x256xf32>
    %cst_3 = arith.constant 1.600000e+01 : f32
    %14 = vector.broadcast %cst_3 : f32 to vector<1x256xf32>
    %15 = arith.mulf %13, %14 : vector<1x256xf32>
    %16 = arith.subf %8, %15 : vector<1x256xf32>
    %17 = arith.addf %13, %2 : vector<1x256xf32>
    %cst_4 = arith.constant 0.000000e+00 : f32
    %cst_5 = arith.constant 1.500000e+01 : f32
    %18 = vector.broadcast %cst_4 : f32 to vector<1x256xf32>
    %19 = arith.maximumf %18, %17 : vector<1x256xf32>
    %20 = vector.broadcast %cst_5 : f32 to vector<1x256xf32>
    %21 = arith.minimumf %20, %19 : vector<1x256xf32>
    %22 = arith.addf %16, %3 : vector<1x256xf32>
    %cst_6 = arith.constant 0.000000e+00 : f32
    %cst_7 = arith.constant 1.500000e+01 : f32
    %23 = vector.broadcast %cst_6 : f32 to vector<1x256xf32>
    %24 = arith.maximumf %23, %22 : vector<1x256xf32>
    %25 = vector.broadcast %cst_7 : f32 to vector<1x256xf32>
    %26 = arith.minimumf %25, %24 : vector<1x256xf32>
    %27 = tpu.iota {dimensions = array<i32: 0>} : vector<16x1xi32>
    %28 = arith.sitofp %27 : vector<16x1xi32> to vector<16x1xf32>
    %29 = tpu.iota {dimensions = array<i32: 0>} : vector<16x1xi32>
    %30 = arith.sitofp %29 : vector<16x1xi32> to vector<16x1xf32>
    %31 = vector.broadcast %28 : vector<16x1xf32> to vector<16x256xf32>
    %32 = vector.broadcast %21 : vector<1x256xf32> to vector<16x256xf32>
    %33 = arith.subf %31, %32 : vector<16x256xf32>
    %34 = math.absf %33 : vector<16x256xf32>
    %cst_8 = arith.constant 1.000000e+00 : f32
    %35 = vector.broadcast %cst_8 : f32 to vector<16x256xf32>
    %36 = arith.subf %35, %34 : vector<16x256xf32>
    %cst_9 = arith.constant 0.000000e+00 : f32
    %37 = vector.broadcast %cst_9 : f32 to vector<16x256xf32>
    %38 = arith.maximumf %37, %36 : vector<16x256xf32>
    %39 = vector.broadcast %30 : vector<16x1xf32> to vector<16x256xf32>
    %40 = vector.broadcast %26 : vector<1x256xf32> to vector<16x256xf32>
    %41 = arith.subf %39, %40 : vector<16x256xf32>
    %42 = math.absf %41 : vector<16x256xf32>
    %cst_10 = arith.constant 1.000000e+00 : f32
    %43 = vector.broadcast %cst_10 : f32 to vector<16x256xf32>
    %44 = arith.subf %43, %42 : vector<16x256xf32>
    %cst_11 = arith.constant 0.000000e+00 : f32
    %45 = vector.broadcast %cst_11 : f32 to vector<16x256xf32>
    %46 = arith.maximumf %45, %44 : vector<16x256xf32>
    %c0_12 = arith.constant 0 : index
    %c0_13 = arith.constant 0 : index
    %c0_14 = arith.constant 0 : index
    %47 = vector.load %arg2[%c0_12, %c0_13, %c0_14] : memref<1x64x16xf32, #tpu.memory_space<vmem>>, vector<1x64x16xf32>
    %48 = vector.shape_cast %47 : vector<1x64x16xf32> to vector<64x16xf32>
    %cst_15 = arith.constant dense<0.000000e+00> : vector<64x256xf32>
    %49 = tpu.matmul %48, %46, %cst_15 {dimension_numbers = #tpu.dot_dimension_numbers<[1], [0], [0], [1], [0, 0, 1, 1], [], []>} : vector<64x16xf32>, vector<16x256xf32>, vector<64x256xf32> -> vector<64x256xf32>
    %50 = vector.extract_strided_slice %49 {offsets = [0, 0], sizes = [16, 256], strides = [1, 1]} : vector<64x256xf32> to vector<16x256xf32>
    %51 = arith.mulf %50, %38 : vector<16x256xf32>
    %cst_16 = arith.constant dense<0.000000e+00> : vector<256xf32>
    %52 = vector.multi_reduction <add>, %51, %cst_16 [0] : vector<16x256xf32> to vector<256xf32>
    %53 = vector.shape_cast %52 : vector<256xf32> to vector<1x256xf32>
    %54 = vector.extract_strided_slice %49 {offsets = [16, 0], sizes = [16, 256], strides = [1, 1]} : vector<64x256xf32> to vector<16x256xf32>
    %55 = arith.mulf %54, %38 : vector<16x256xf32>
    %cst_17 = arith.constant dense<0.000000e+00> : vector<256xf32>
    %56 = vector.multi_reduction <add>, %55, %cst_17 [0] : vector<16x256xf32> to vector<256xf32>
    %57 = vector.shape_cast %56 : vector<256xf32> to vector<1x256xf32>
    %58 = vector.extract_strided_slice %49 {offsets = [32, 0], sizes = [16, 256], strides = [1, 1]} : vector<64x256xf32> to vector<16x256xf32>
    %59 = arith.mulf %58, %38 : vector<16x256xf32>
    %cst_18 = arith.constant dense<0.000000e+00> : vector<256xf32>
    %60 = vector.multi_reduction <add>, %59, %cst_18 [0] : vector<16x256xf32> to vector<256xf32>
    %61 = vector.shape_cast %60 : vector<256xf32> to vector<1x256xf32>
    %62 = vector.extract_strided_slice %49 {offsets = [48, 0], sizes = [16, 256], strides = [1, 1]} : vector<64x256xf32> to vector<16x256xf32>
    %63 = arith.mulf %62, %38 : vector<16x256xf32>
    %cst_19 = arith.constant dense<0.000000e+00> : vector<256xf32>
    %64 = vector.multi_reduction <add>, %63, %cst_19 [0] : vector<16x256xf32> to vector<256xf32>
    %65 = vector.shape_cast %64 : vector<256xf32> to vector<1x256xf32>
    %66 = tpu.concatenate %53, %57, %61, %65 in 0 : vector<1x256xf32>, vector<1x256xf32>, vector<1x256xf32>, vector<1x256xf32> -> vector<4x256xf32>
    %c0_20 = arith.constant 0 : index
    %c0_21 = arith.constant 0 : index
    %c0_22 = arith.constant 0 : index
    %67 = vector.load %arg4[%c0_20, %c0_21, %c0_22] : memref<1x4x256xf32, #tpu.memory_space<vmem>>, vector<1x4x256xf32>
    %68 = vector.shape_cast %67 : vector<1x4x256xf32> to vector<4x256xf32>
    %69 = vector.shape_cast %66 : vector<4x256xf32> to vector<1x4x256xf32>
    tpu.vector_store %arg4[%c0_20, %c0_21, %c0_22], %69 {strides = array<i32>} : memref<1x4x256xf32, #tpu.memory_space<vmem>>, vector<1x4x256xf32>,
    return
  }
  func.func @transform_0(%arg0: i32, %arg1: i32) -> (i32, i32, i32) {
    %c0_i32 = arith.constant 0 : i32
    %c0_i32_0 = arith.constant 0 : i32
    %c0_i32_1 = arith.constant 0 : i32
    return %arg0, %c0_i32, %c0_i32_0 : i32, i32, i32
  }
  func.func @transform_1(%arg0: i32, %arg1: i32) -> (i32, i32, i32) {
    %c0_i32 = arith.constant 0 : i32
    %c0_i32_0 = arith.constant 0 : i32
    return %arg0, %c0_i32, %arg1 : i32, i32, i32
  }
  func.func @transform_2(%arg0: i32, %arg1: i32) -> (i32, i32, i32) {
    %c0_i32 = arith.constant 0 : i32
    %c0_i32_0 = arith.constant 0 : i32
    return %arg0, %c0_i32, %arg1 : i32, i32, i32
  }
}

</mosaic_0001>

<bundles_post_ra>
// kernel: tpu_custom_call.1
= control target key start
LH: loop header
LB: loop body
LE: loop exit
PB: predicated region body
PF: predicated region fallthrough
CT: control target
= control target key end

     0   :  { %7 = vsyncpa [#allocation3], 0  ;;  %s1002_s0 = inlined_call_operand.vmem [shape: f32[2,64,16], index: 0, kind: input, shape index: {}]   ;;  %s1003_s1 = inlined_call_operand.vmem [shape: f32[2,2,256], index: 1, kind: input, shape index: {}]   ;;  %s1004_s2 = inlined_call_operand.hbm [shape: f32[2,4,256], index: 2, kind: output, shape index: {}]  }
   0x1   :  { %9 = vsyncpa [#allocation3 + $0x1], 0  ;;  %s817_s9 = smov 0   ;;  %s819_s10 = smov 0  }
   0x2   :  { %s821_s11 = smov 0   ;;  %s823_s12 = smov 0  }
   0x3   :  { %s825_s13 = smov 0   ;;  %s827_s14 = smov 0  }
   0x4 LB: > { %s636_s15 = sadd.s32 4294967295, %s798_s14   ;;  %s637_s16 = sadd.s32 4294967294, %s798_s14   ;;  %s798_s14 = sphi %s827_s14, %s15_s14   ;;  %s794_s13 = sphi %s825_s13, %s1011_s13   ;;  %s790_s12 = sphi %s823_s12, %s1010_s12   ;;  %s786_s11 = sphi %s821_s11, %s1009_s11   ;;  %s782_s10 = sphi %s819_s10, %s1008_s10   ;;  %s778_s9 = sphi %s817_s9, %s1007_s9  }
   0x5   : > { %s27_s17 = sadd.s32 1, %s794_s13  ;;  %s90_s18 = sadd.s32 1, %s786_s11 }
   0x6   : > { %p29_p0 = scmp.ge.s32.totalorder %s27_s17, 2  ;;  %p100_p1 = scmp.ne.s32.totalorder %s786_s11, %s782_s10 }
   0x7   : > { %p101_p2 = scmp.eq.s32.totalorder %s636_s15, 1  ;;  %p106_p3 = scmp.ne.s32.totalorder %s782_s10, %s778_s9 }
   0x8   : > { %s1013_s17 = smov (%p29_p0, %s27_s17), 0  ;;  %p107_p5 = scmp.eq.s32.totalorder %s637_s16, 1 }
   0x9   : > { %p857_p4 = por %p101_p2, %p100_p1  ;;  %s85_s20 = ssub.s32 %s794_s13, %s1013_s17 }
   0xa   : > { %p640_p6 = scmp.ge.s32.totalorder %s798_s14, 1  ;;  %p88_p7 = scmp.eq.s32.totalorder %s85_s20, 0 }
   0xb   : > { %p864_p8 = por %p107_p5, %p106_p3  ;;  %p146_p9 = scmp.lt.s32.totalorder %s798_s14, 3 }
   0xc   : > { %s870_s22 = scalar_select %p88_p7, %s786_s11, %s90_s18  }
   0xd   : > { %p147_p10 = pnand %p640_p6, %p146_p9 }
   0xe   : > { %p177_p11 = scmp.lt.s32.totalorder (!%p147_p10), %s790_s12, 1  ;;  %s174_s4 = sand.u32 (!%p147_p10), 1, %s782_s10  }
   0xf   : > { %150 = sbr.rel (%p147_p10) target bundleno = 299 (0x12b), region = 28  ;;  %s641_s5 = sshll.u32 (!%p147_p10), %s174_s4, 3 }
  0x10   : > { %s661_s6 = sshll.u32 (!%p147_p10), %s790_s12, 7  ;;  %s176_s7 = scalar_lea.vmem (!%p147_p10), [#allocation2], %s641_s5 }
  0x11   : > { %s548_s8 = sshll.u32 (!%p147_p10), %s176_s7, 4  ;;  %s546_s18 = scalar_lea.hbm (!%p147_p10), %s1004_s2, %s661_s6  ;;  %s549_s8 = int_to_ptr.vmem [resolvable:$true] %s548_s8 }
  0x12   : > { %s532_s20 = scalar_lea.sflag (!%p147_p10), [#allocation3], %s174_s4 }
  0x14   : > { %v194_v0 = vlaneseq  ;;  %v800_v1 = vmov 0.0   ;;  %s876_s23 = scalar_select %p177_p11, %s790_s12, 1  ;;  %vm307_vm0 = vcmask 130048   ;;  %vm517_vm1 = vcmask 1040384  }
  0x15   : > { %396 = vmatprep.mubr.f32.mxu0 %v800_v1  ;;  %420 = vmatprep.mubr.f32.mxu1 %v800_v1  ;;  %vm520_vm2 = vcmask 1041408   ;;  %vm523_vm3 = vcmask 1042432   ;;  %s801_s12 = smov [#allocation2]  }
  0x16   : > { %v195_v2 = vand.u32 127, %v194_v0  ;;  %s660_s24 = sshll.u32 %s876_s23, 2  ;;  %v879_v4 = vshrl.u32 %v194_v0, 7  ;;  %s659_s28 = sshll.u32 %s876_s23, 6 }
  0x17   : > { %s190_s27 = scalar_lea.vmem %s1003_s1, %s660_s24  ;;  %s919_s3 = scalar_lea.vmem %s1002_s0, %s659_s28 }
  0x18   : > { %v196_v3 = vadd.s32 128, %v195_v2  ;;  %v201_v5 = vcvt.s32.f32 %v195_v2  ;;  %v232_v10 = vsub.s32 1, %v879_v4  ;;  %v887_v11 = vld [vmem:[%s190_s27] sm:$0xf]  ;;  %v236_v13 = vsub.s32 3, %v879_v4  ;;  %v300_v52 = vld [vmem:[%s919_s3 + $0x8] sm:$0xff] }
  0x19   : > { %v248_v22 = vadd.s32 8, %v879_v4  ;;  %v902_v25 = vsub.s32 0, %v879_v4  ;;  %v907_v30 = vcvt.s32.f32 %v879_v4  ;;  %v299_v50 = vld [vmem:[%s919_s3] sm:$0xff]  ;;  %v304_v53 = vld [vmem:[%s919_s3 + $0x28] sm:$0xff]  ;;  %v301_v54 = vld [vmem:[%s919_s3 + $0x10] sm:$0xff]  ;;  %v220_v58 = vsub.s32 2, %v879_v4 }
  0x1a   : > { %v202_v6 = vcvt.s32.f32 %v196_v3  ;;  %v203_v7 = vadd.f32 0.5, %v201_v5  ;;  %v233_v17 = vrot.slane %v887_v11, %v232_v10  ;;  %v237_v19 = vrot.slane %v887_v11, %v236_v13  ;;  %v303_v51 = vld [vmem:[%s919_s3 + $0x20] sm:$0xff]  ;;  %v305_v55 = vld [vmem:[%s919_s3 + $0x30] sm:$0xff]  ;;  %v302_v56 = vld [vmem:[%s919_s3 + $0x18] sm:$0xff]  ;;  %s722_s23 = scalar_lea.vmem %s549_s8, 128  ;;  %s726_s24 = sshll.u32 %s801_s12, 4  ;;  %s727_s24 = int_to_ptr.vmem [resolvable:$false] %s726_s24 }
  0x1b   : > { %v904_v28 = vcvt.s32.f32 %v248_v22  ;;  %v306_v57 = vld [vmem:[%s919_s3 + $0x38] sm:$0xff]  ;;  %v217_v59 = vrot.slane %v887_v11, %v902_v25  ;;  %v221_v60 = vrot.slane %v887_v11, %v220_v58  ;;  %p723_p12 = scmp.ne.s32.totalorder %s549_s8, %s722_s23  ;;  %s728_s25 = scalar_lea.vmem %s727_s24, 256 }
  0x1c   : > { %v204_v8 = vadd.f32 0.5, %v202_v6  ;;  %v884_v9 = vmul.f32 0.0625, %v203_v7  ;;  %p729_p1 = scmp.lt.s32.totalorder %s549_s8, %s727_s24  ;;  %p730_p2 = scmp.lt.s32.totalorder %s728_s25, %s722_s23 }
  0x1d   : > { %p724_p13 = pnand %p723_p12, %p857_p4 }
  0x1e   : > { %v889_v12 = vmul.f32 0.0625, %v204_v8  ;;  %v207_v14 = vfloor.f32 %v884_v9  ;;  %p731_p3 = por %p730_p2, %p729_p1 }
  0x1f   : > { %p725_p0 = pneg %p724_p13 }
  0x20   : > { %v208_v15 = vfloor.f32 %v889_v12  ;;  %v209_v16 = vmul.f32 16.0, %v207_v14  ;;  %v224_v61 = vadd.f32 %v217_v59, %v207_v14 }
  0x21   : > { %p732_p5 = pnand %p731_p3, %p725_p0 }
  0x22   : > { %v210_v18 = vmul.f32 16.0, %v208_v15  ;;  %v211_v20 = vsub.f32 %v201_v5, %v209_v16  ;;  %v225_v62 = vadd.f32 %v221_v60, %v208_v15  ;;  %v226_v63 = vmax.f32 %v224_v61, 0.0 }
  0x24   : > { %v212_v21 = vsub.f32 %v202_v6, %v210_v18  ;;  %v240_v23 = vadd.f32 %v233_v17, %v211_v20  ;;  %v227_v0 = vmax.f32 %v225_v62, 0.0 }
  0x26   : > { %v241_v24 = vadd.f32 %v237_v19, %v212_v21  ;;  %v242_v26 = vmax.f32 %v240_v23, 0.0  ;;  %v229_v2 = vmin.f32 %v227_v0, 15.0 }
  0x28   : > { %v243_v27 = vmax.f32 %v241_v24, 0.0  ;;  %v244_v29 = vmin.f32 %v242_v26, 15.0  ;;  %v258_v5 = vrot.slane %v229_v2, %v902_v25 }
  0x2a   : > { %v245_v31 = vmin.f32 %v243_v27, 15.0  ;;  %v278_v32 = vrot.slane %v244_v29, %v902_v25  ;;  %v260_v7 = vsub.f32 %v907_v30, %v258_v5  ;;  %v262_v8 = vsub.f32 %v904_v28, %v258_v5 }
  0x2c   : > { %v282_v33 = vrot.slane %v245_v31, %v902_v25  ;;  %v285_v34 = vsub.f32 %v904_v28, %v278_v32  ;;  %v283_v35 = vsub.f32 %v907_v30, %v278_v32  ;;  %v264_v11 = vand.u32 2147483647, %v260_v7 }
  0x2d   : > { %v266_v12 = vand.u32 2147483647, %v262_v8 }
  0x2e   : > { %v286_v36 = vsub.f32 %v904_v28, %v282_v33  ;;  %v284_v37 = vsub.f32 %v907_v30, %v282_v33  ;;  %v289_v38 = vand.u32 2147483647, %v285_v34  ;;  %v287_v39 = vand.u32 2147483647, %v283_v35 }
  0x2f   : > { %v268_v15 = vsub.f32 1.0, %v264_v11  ;;  %v270_v16 = vsub.f32 1.0, %v266_v12 }
  0x30   : > { %v290_v40 = vand.u32 2147483647, %v286_v36  ;;  %v288_v41 = vand.u32 2147483647, %v284_v37  ;;  %v293_v42 = vsub.f32 1.0, %v289_v38  ;;  %v291_v43 = vsub.f32 1.0, %v287_v39 }
  0x31   : > { %v272_v21 = vmax.f32 %v268_v15, 0.0  ;;  %v274_v24 = vmax.f32 %v270_v16, 0.0 }
  0x32   : > { %v294_v44 = vsub.f32 1.0, %v290_v40  ;;  %v292_v45 = vsub.f32 1.0, %v288_v41  ;;  %v297_v46 = vmax.f32 %v293_v42, 0.0  ;;  %v295_v49 = vmax.f32 %v291_v43, 0.0 }
  0x34   : > { %v298_v47 = vmax.f32 %v294_v44, 0.0  ;;  %v296_v48 = vmax.f32 %v292_v45, 0.0 }
  0x36   : > { %360 = vmatprep.subr.mxu0 %v298_v47  ;;  %662 = vmatprep.subr.mxu1 %v298_v47 }
  0x37   : > { %361 = vmatpush1.msra.mxu0 %v297_v46  ;;  %664 = vmatpush1.msra.mxu1 %v297_v46 }
  0x38   : > { %362 = vmatprep.subr.mxu0 %v296_v48  ;;  %663 = vmatprep.subr.mxu1 %v296_v48 }
  0x39   : > { %363 = vmatpush1.msra.mxu0 %v295_v49  ;;  %665 = vmatpush1.msra.mxu1 %v295_v49 }
  0x3a   : > { %646 = vmatmul.mubr.msk.f32.vlgmr.msra.gmra.mxu0 %vm307_vm0, %v299_v50  ;;  %650 = vmatmul.mubr.msk.f32.vlgmr.msra.gmra.mxu1 %vm307_vm0, %v303_v51 }
  0x3b   : > { %402 = vmatprep.mubr.f32.mxu0 %v800_v1  ;;  %426 = vmatprep.mubr.f32.mxu1 %v800_v1 }
  0x3e   : > { %647 = vmatmul.mubr.msk.f32.gmra.mxu0 %vm307_vm0, %v300_v52  ;;  %651 = vmatmul.mubr.msk.f32.gmra.mxu1 %vm307_vm0, %v304_v53 }
  0x3f   : > { %408 = vmatprep.mubr.f32.mxu0 %v800_v1  ;;  %432 = vmatprep.mubr.f32.mxu1 %v800_v1 }
  0x42   : > { %648 = vmatmul.mubr.msk.f32.gmra.mxu0 %vm307_vm0, %v301_v54  ;;  %652 = vmatmul.mubr.msk.f32.gmra.mxu1 %vm307_vm0, %v305_v55 }
  0x43   : > { %414 = vmatprep.mubr.f32.mxu0 %v800_v1  ;;  %438 = vmatprep.mubr.f32.mxu1 %v800_v1  ;;  %v228_v1 = vmin.f32 %v226_v63, 15.0 }
  0x45   : > { %v254_v3 = vrot.slane %v228_v1, %v902_v25 }
  0x46   : > { %649 = vmatmul.mubr.msk.f32.gmra.mxu0 %vm307_vm0, %v302_v56  ;;  %653 = vmatmul.mubr.msk.f32.gmra.mxu1 %vm307_vm0, %v306_v57 }
  0x47   : > { %v259_v4 = vsub.f32 %v907_v30, %v254_v3  ;;  %v261_v6 = vsub.f32 %v904_v28, %v254_v3 }
  0x49   : > { %v263_v9 = vand.u32 2147483647, %v259_v4  ;;  %v265_v10 = vand.u32 2147483647, %v261_v6 }
  0x4b   : > { %v267_v13 = vsub.f32 1.0, %v263_v9  ;;  %v269_v14 = vsub.f32 1.0, %v265_v10 }
  0x4d   : > { %v271_v19 = vmax.f32 %v267_v13, 0.0  ;;  %v273_v20 = vmax.f32 %v269_v14, 0.0 }
  0xfa   : > { %v398_v17 = vpop.f32.mrf.mxu0  ;;  %v422_v18 = vpop.f32.mrf.mxu1 }
  0xfb   : > { %v445_v27 = vmul.f32 %v398_v17, %v271_v19  ;;  %v481_v28 = vmul.f32 %v422_v18, %v271_v19 }
  0xfc   : > { %v400_v22 = vpop.f32.mrf.mxu0  ;;  %v424_v23 = vpop.f32.mrf.mxu1 }
  0xfd   : > { %v446_v31 = vmul.f32 %v400_v22, %v272_v21  ;;  %v482_v32 = vmul.f32 %v424_v23, %v272_v21 }
  0xfe   : > { %v404_v25 = vpop.f32.mrf.mxu0  ;;  %v428_v26 = vpop.f32.mrf.mxu1 }
  0xff   : > { %v447_v29 = vmul.f32 %v404_v25, %v273_v20  ;;  %v483_v30 = vmul.f32 %v428_v26, %v273_v20 }
 0x100   : > { %v406_v33 = vpop.f32.mrf.mxu0  ;;  %v430_v34 = vpop.f32.mrf.mxu1 }
 0x101   : > { %v449_v35 = vadd.f32 %v447_v29, %v445_v27  ;;  %v485_v36 = vadd.f32 %v483_v30, %v481_v28  ;;  %v448_v37 = vmul.f32 %v406_v33, %v274_v24  ;;  %v484_v38 = vmul.f32 %v430_v34, %v274_v24 }
 0x102   : > { %v410_v39 = vpop.f32.mrf.mxu0  ;;  %v434_v40 = vpop.f32.mrf.mxu1 }
 0x103   : > { %v450_v41 = vrot.slane %v449_v35, 4  ;;  %v486_v42 = vrot.slane %v485_v36, 4  ;;  %v456_v43 = vadd.f32 %v448_v37, %v446_v31  ;;  %v492_v44 = vadd.f32 %v484_v38, %v482_v32 }
 0x104   : > { %v412_v45 = vpop.f32.mrf.mxu0  ;;  %v436_v46 = vpop.f32.mrf.mxu1  ;;  %v463_v54 = vmul.f32 %v410_v39, %v271_v19  ;;  %v499_v55 = vmul.f32 %v434_v40, %v271_v19 }
 0x105   : > { %v451_v47 = vadd.f32 %v450_v41, %v449_v35  ;;  %v457_v48 = vrot.slane %v456_v43, 4  ;;  %v493_v49 = vrot.slane %v492_v44, 4  ;;  %v487_v52 = vadd.f32 %v486_v42, %v485_v36 }
 0x106   : > { %v416_v50 = vpop.f32.mrf.mxu0  ;;  %v440_v51 = vpop.f32.mrf.mxu1  ;;  %v464_v62 = vmul.f32 %v412_v45, %v272_v21  ;;  %v500_v63 = vmul.f32 %v436_v46, %v272_v21 }
 0x107   : > { %v458_v53 = vadd.f32 %v457_v48, %v456_v43  ;;  %v465_v56 = vmul.f32 %v416_v50, %v273_v20  ;;  %v501_v57 = vmul.f32 %v440_v51, %v273_v20  ;;  %v452_v60 = vrot.slane %v451_v47, 2 }
 0x108   : > { %v418_v58 = vpop.f32.mrf.mxu0  ;;  %v442_v59 = vpop.f32.mrf.mxu1  ;;  %v494_v61 = vadd.f32 %v493_v49, %v492_v44  ;;  %v488_v5 = vrot.slane %v487_v52, 2 }
 0x109   : > { %v467_v0 = vadd.f32 %v465_v56, %v463_v54  ;;  %v503_v1 = vadd.f32 %v501_v57, %v499_v55  ;;  %v466_v2 = vmul.f32 %v418_v58, %v274_v24  ;;  %v502_v3 = vmul.f32 %v442_v59, %v274_v24 }
 0x10a   : > { %v459_v4 = vrot.slane %v458_v53, 2  ;;  %v453_v10 = vadd.f32 %v452_v60, %v451_v47  ;;  %v495_v11 = vrot.slane %v494_v61, 2  ;;  %v489_v16 = vadd.f32 %v488_v5, %v487_v52 }
 0x10b   : > { %v468_v6 = vrot.slane %v467_v0, 4  ;;  %v504_v7 = vrot.slane %v503_v1, 4  ;;  %v474_v8 = vadd.f32 %v466_v2, %v464_v62  ;;  %v510_v9 = vadd.f32 %v502_v3, %v500_v63 }
 0x10c   : > { %v460_v17 = vadd.f32 %v459_v4, %v458_v53  ;;  %v454_v22 = vrot.slane %v453_v10, 1  ;;  %v496_v23 = vadd.f32 %v495_v11, %v494_v61  ;;  %v490_v28 = vrot.slane %v489_v16, 1 }
 0x10d   : > { %v469_v12 = vadd.f32 %v468_v6, %v467_v0  ;;  %v505_v13 = vadd.f32 %v504_v7, %v503_v1  ;;  %v475_v14 = vrot.slane %v474_v8, 4  ;;  %v511_v15 = vrot.slane %v510_v9, 4 }
 0x10e   : > { %v461_v29 = vrot.slane %v460_v17, 1  ;;  %v455_v33 = vadd.f32 %v454_v22, %v453_v10  ;;  %v497_v34 = vrot.slane %v496_v23, 1  ;;  %v491_v39 = vadd.f32 %v490_v28, %v489_v16 }
 0x10f   : > { %v470_v18 = vrot.slane %v469_v12, 2  ;;  %v506_v19 = vrot.slane %v505_v13, 2  ;;  %v476_v20 = vadd.f32 %v475_v14, %v474_v8  ;;  %v512_v21 = vadd.f32 %v511_v15, %v510_v9 }
 0x110   : > { %v462_v40 = vadd.f32 %v461_v29, %v460_v17  ;;  %v498_v43 = vadd.f32 %v497_v34, %v496_v23 }
 0x111   : > { %v471_v24 = vadd.f32 %v470_v18, %v469_v12  ;;  %v507_v25 = vadd.f32 %v506_v19, %v505_v13  ;;  %v477_v26 = vrot.slane %v476_v20, 2  ;;  %v513_v27 = vrot.slane %v512_v21, 2 }
 0x113   : > { %v472_v30 = vrot.slane %v471_v24, 1  ;;  %v478_v31 = vadd.f32 %v477_v26, %v476_v20  ;;  %v514_v32 = vadd.f32 %v513_v27, %v512_v21  ;;  %v508_v36 = vrot.slane %v507_v25, 1 }
 0x115   : > { %v473_v35 = vadd.f32 %v472_v30, %v471_v24  ;;  %v479_v37 = vrot.slane %v478_v31, 1  ;;  %v515_v38 = vrot.slane %v514_v32, 1  ;;  %v509_v45 = vadd.f32 %v508_v36, %v507_v25 }
 0x117   : > { %v480_v41 = vadd.f32 %v479_v37, %v478_v31  ;;  %v518_v42 = vsel %vm517_vm1, %v455_v33, %v473_v35  ;;  %v516_v46 = vadd.f32 %v515_v38, %v514_v32 }
 0x118   : > { %v521_v44 = vsel %vm520_vm2, %v518_v42, %v491_v39 }
 0x119   : > { %v519_v47 = vsel %vm517_vm1, %v462_v40, %v480_v41  ;;  %v524_v49 = vsel %vm523_vm3, %v521_v44, %v509_v45 }
 0x11a   : > { %v522_v48 = vsel %vm520_vm2, %v519_v47, %v498_v43 }
 0x11b   : > { %v525_v50 = vsel %vm523_vm3, %v522_v48, %v516_v46 }
 0x11c   : > { %v528_v51 = vcombine.low %v524_v49, %v525_v50 }
 0x11e   : > { %530 = vst [vmem:[%s176_s7] sm:$0xff] %v528_v51 }
 0x11f   : > { %735 = shalt.err (!%p732_p5)
}
 0x120   : > { %s736_s26 = scalar_lea.hbm %s546_s18, 128  ;;  %s740_s29 = scalar_lea.hbm %s1004_s2, 256 }
 0x121   : > { %p737_p6 = scmp.ne.s32.totalorder %s546_s18, %s736_s26  ;;  %p741_p10 = scmp.lt.s32.totalorder %s546_s18, %s1004_s2 }
 0x122   : > { %p742_p11 = scmp.lt.s32.totalorder %s740_s29, %s736_s26 }
 0x123   : > { %p738_p7 = pnand %p737_p6, %p857_p4 }
 0x124   : > { %p743_p12 = por %p742_p11, %p741_p10 }
 0x125   : > { %p739_p9 = pneg %p738_p7 }
 0x127   : > { %p744_p13 = pnand %p743_p12, %p739_p9 }
 0x129   : > { %747 = shalt.err (!%p744_p13)
}
 0x12a   : > { %666 = dma.vmem_to_hbm [thread:$0]  (%p857_p4), %s549_s8, 128, %s546_s18, %s532_s20  }
 0x12b PF: > { %p672_p0 = scmp.ge.s32.totalorder %s798_s14, 2  ;;  %s560_s4 = sand.u32 1, %s778_s9  }
 0x12c   : > { %s561_s5 = scalar_lea.sflag [#allocation3], %s560_s4 }
 0x12d   : > { %p669_p1 = pnand %p672_p0, %p864_p8 }
 0x12f   : > { %p670_p2 = pneg %p669_p1 }
 0x131   : > { %773 = dma.done.wait (%p670_p2), %s561_s5, 128  }
 0x132   : > { %775 = vsyncadd (%p670_p2), %s561_s5, 4294967168  ;;  %s15_s14 = sadd.s32 1, %s798_s14   ;;  %s1007_s9 = smov %s782_s10 }
 0x133   : > { %p12_p3 = scmp.ge.s32.totalorder %s15_s14, 4   ;;  %s1008_s10 = smov %s786_s11 }
 0x134   : > { %s1009_s11 = smov %s870_s22  ;;  %s1010_s12 = smov %s794_s13 }
 0x135   : > { %s1011_s13 = smov %s1013_s17  ;;  %14 = sbr.rel (!%p12_p3) target bundleno = 4 (0x4), region = 66 }
 0x13a   :  { %566 = vsyncpa [#allocation3], 1 }
 0x13b   :  { %568 = vsyncpa [#allocation3 + $0x1], 1 }

</bundles_post_ra>
